<compile_context>
chip_gen: v7x
topology: tpu7x:2x2x1
jax: 0.10.0
libtpu: 0.0.40
codegen_flags: <defaults>
</compile_context>

<pallas_src>
import functools

import jax
import jax.numpy as jnp
from jax.experimental import pallas as pl
from jax.experimental.pallas import tpu as pltpu

BN_EPS = 1e-5
L2_EPS = 1e-12
LANE = 128
SUBLANE = 8


def _round_up(x, m):
    return ((x + m - 1) // m) * m


def _vmem_capacity_bytes():
    try:
        return int(pltpu.get_tpu_info().vmem_capacity_bytes)
    except Exception:
        return 64 << 20  # conservative default = v7x per-TC VMEM


def _pick_block_b(B, per_row_bytes, const_bytes, vmem_cap):
    # ~65% of per-core VMEM for the double-buffered streaming tiles
    # (~40 MiB on v7x / 64 MiB, ~80+ MiB on v5e/v6e / 128 MiB), minus the
    # resident constants.
    budget = max(int(vmem_cap * 0.65) - 2 * const_bytes, 4 << 20)
    tb_vmem = max(SUBLANE, (budget // max(per_row_bytes, 1)) // SUBLANE * SUBLANE)
    # keep >= 2 grid steps when the batch allows so v7x's second TensorCore gets
    # a "parallel" tile (harmless on single-TC v5e/v6e; per-step cost ~0.35us).
    tb_split = max(SUBLANE, _round_up(pl.cdiv(B, 2), SUBLANE))
    return max(SUBLANE, min(tb_vmem, tb_split, 1024))


# ---------------------------------------------------------------------------
# Kernel
# ---------------------------------------------------------------------------
def _two_tower_kernel(seq_ref, uc_ref, pool_ref, wuc_ref, wseq_ref, b_ref, o_ref):
    # seq_ref : (TB, S*D)      seq embeddings, row-major flattened, storage dtype
    #                          (padding positions are exactly-zero embedding rows)
    # uc_ref  : (TB, UCW) f32  [user | cand | 0-pad | 1/count]
    # pool_ref: (S*D, Dp)      stacked-identity 0/1 pooling matrix (seq dtype)
    # wuc_ref : (UCW, 2*Dp)    [[Wq_user, 0], [0, Wc], [0, 0]]  (BN folded)
    # wseq_ref: (Dp, Dp)       Wq_seq                           (BN folded)
    # b_ref   : (1, 2*Dp)      [bq | bc]                        (BN folded)
    # o_ref   : (TB, 1)        (cos_sim + 1) / 2
    Dp = wseq_ref.shape[0]
    ucw = uc_ref.shape[1]

    # ---- masked mean pooling as one MXU matmul (sum over S), f32 accumulate --
    pooled = jnp.dot(seq_ref[...], pool_ref[...],
                     preferred_element_type=jnp.float32)          # (TB, Dp)

    uc = uc_ref[...]                                              # (TB, UCW)
    inv_cnt = uc[:, ucw - 1:]                                     # (TB, 1)
    seq_rep = pooled * inv_cnt                                    # mean pooling

    # ---- towers: user/cand packed into one matmul; seq half kept separate ----
    #      because of the per-row 1/count scaling. BN(eval) folded on host.
    qc = jnp.dot(uc, wuc_ref[...], preferred_element_type=jnp.float32) + b_ref[...]
    q = qc[:, :Dp] + jnp.dot(seq_rep, wseq_ref[...],
                             preferred_element_type=jnp.float32)  # (TB, Dp)
    c = qc[:, Dp:]                                                # (TB, Dp)

    # ---- L2 normalize + cosine via rsqrt (EUP), F.normalize eps clamp --------
    inv_q = jnp.minimum(jax.lax.rsqrt(jnp.sum(q * q, axis=1, keepdims=True)),
                        1.0 / L2_EPS)
    inv_c = jnp.minimum(jax.lax.rsqrt(jnp.sum(c * c, axis=1, keepdims=True)),
                        1.0 / L2_EPS)
    dot_qc = jnp.sum(q * c, axis=1, keepdims=True)

    o_ref[...] = (dot_qc * inv_q * inv_c + 1.0) * 0.5


# ---------------------------------------------------------------------------
# Wrapper: BN fold + weight packing (tiny, host side), tiling heuristic,
#          pallas_call. The dominant seq stream is passed through untouched.
# ---------------------------------------------------------------------------
@functools.partial(jax.jit, static_argnames=("block_b",))
def two_tower_forward_pallas(
    seq_embeds, count, user_embed, cand_embed,
    wq, bq, bnq_g, bnq_b, bnq_m, bnq_v,
    wc, bc, bnc_g, bnc_b, bnc_m, bnc_v,
    block_b=None,
):
    B, S, D = seq_embeds.shape
    SD = S * D
    Dp = _round_up(D, LANE)                 # lane-aligned tower width (weights only)
    UCW = _round_up(2 * D + 1, LANE)        # [user | cand | pad | 1/count]

    # ---- fold BatchNorm (eval) into the Linear layers ------------------------
    sq = bnq_g * jax.lax.rsqrt(bnq_v + BN_EPS)
    wq_f = (wq * sq).astype(jnp.float32)                 # (2D, D)
    bq_f = ((bq - bnq_m) * sq + bnq_b).astype(jnp.float32)
    sc = bnc_g * jax.lax.rsqrt(bnc_v + BN_EPS)
    wc_f = (wc * sc).astype(jnp.float32)                 # (D, D)
    bc_f = ((bc - bnc_m) * sc + bnc_b).astype(jnp.float32)

    # ---- pack user/cand tower weights into one (UCW, 2*Dp) matrix ------------
    w_uc = jnp.zeros((UCW, 2 * Dp), jnp.float32)
    w_uc = w_uc.at[:D, :D].set(wq_f[:D])                 # user half -> q columns
    w_uc = w_uc.at[D:2 * D, Dp:Dp + D].set(wc_f)         # cand       -> c columns
    w_seq = jnp.zeros((Dp, Dp), jnp.float32).at[:D, :D].set(wq_f[D:])
    b_row = jnp.zeros((1, 2 * Dp), jnp.float32)
    b_row = b_row.at[:, :D].set(bq_f).at[:, Dp:Dp + D].set(bc_f)

    # ---- stacked-identity pooling matrix (exact 0/1, same dtype as stream) ---
    pool = jnp.tile(
        jnp.pad(jnp.eye(D, dtype=seq_embeds.dtype), ((0, 0), (0, Dp - D))),
        (S, 1))                                          # (S*D, Dp)

    # ---- dominant stream: no cast, no pad; reshape is a free bitcast ---------
    seq_flat = seq_embeds.reshape(B, SD)

    # ---- small per-row vector: [user | cand | 0-pad | 1/count] ---------------
    inv_count = 1.0 / jnp.maximum(count.astype(jnp.float32).reshape(B, 1), 1.0)
    uc = jnp.concatenate(
        [user_embed.astype(jnp.float32), cand_embed.astype(jnp.float32),
         jnp.zeros((B, UCW - 2 * D - 1), jnp.float32), inv_count], axis=1)

    # ---- generation-aware batch tile size / VMEM limit ------------------------
    seq_bytes = jnp.dtype(seq_embeds.dtype).itemsize
    per_row = 2 * (SD * seq_bytes + UCW * 4 + 4)         # double-buffered streams
    const_bytes = (SD * Dp * seq_bytes + UCW * 2 * Dp * 4 + Dp * Dp * 4 + 2 * Dp * 4)
    vmem_cap = _vmem_capacity_bytes()
    TB = block_b if block_b is not None else _pick_block_b(B, per_row, const_bytes, vmem_cap)
    grid = (pl.cdiv(B, TB),)                             # no batch padding pass
    vmem_limit = int(min(vmem_cap,
                         max(TB * per_row + 2 * const_bytes + (8 << 20), 32 << 20)))

    def _const_spec(shape):
        zeros = (0,) * len(shape)
        return pl.BlockSpec(shape, lambda i, _z=zeros: _z,
                            pipeline_mode=pl.Buffered(1))   # single-buffer constants

    out = pl.pallas_call(
        _two_tower_kernel,
        out_shape=jax.ShapeDtypeStruct((B, 1), jnp.float32),
        grid=grid,
        in_specs=[
            pl.BlockSpec((TB, SD), lambda i: (i, 0)),    # seq embeddings (dominant)
            pl.BlockSpec((TB, UCW), lambda i: (i, 0)),   # [user|cand|pad|1/count]
            _const_spec((SD, Dp)),                       # pooling matrix (resident)
            _const_spec((UCW, 2 * Dp)),                  # packed tower weights
            _const_spec((Dp, Dp)),                       # seq-tower weights
            _const_spec((1, 2 * Dp)),                    # packed biases
        ],
        out_specs=pl.BlockSpec((TB, 1), lambda i: (i, 0)),
        compiler_params=pltpu.CompilerParams(
            dimension_semantics=("parallel",),
            vmem_limit_bytes=vmem_limit,
        ),
    )(seq_flat, uc, pool, w_uc, w_seq, b_row)

    return out[:, 0]


# ---------------------------------------------------------------------------
# Pure-JAX reference (mirrors the PyTorch forward, eval mode, UNFUSED params)
# ---------------------------------------------------------------------------
def two_tower_forward_ref(
    seq_embeds, mask_f, user_embed, cand_embed,
    wq, bq, bnq_g, bnq_b, bnq_m, bnq_v,
    wc, bc, bnc_g, bnc_b, bnc_m, bnc_v,
):
    summed = jnp.sum(seq_embeds * mask_f, axis=1)
    count = jnp.maximum(jnp.sum(mask_f, axis=1), 1.0)
    seq_rep = summed / count
    combined = jnp.concatenate([user_embed, seq_rep], axis=1)
    q = combined @ wq + bq
    q = (q - bnq_m) / jnp.sqrt(bnq_v + BN_EPS) * bnq_g + bnq_b
    c = cand_embed @ wc + bc
    c = (c - bnc_m) / jnp.sqrt(bnc_v + BN_EPS) * bnc_g + bnc_b
    qn = q / jnp.maximum(jnp.linalg.norm(q, axis=1, keepdims=True), L2_EPS)
    cn = c / jnp.maximum(jnp.linalg.norm(c, axis=1, keepdims=True), L2_EPS)
    cos = jnp.sum(qn * cn, axis=1)
    return (cos + 1.0) / 2.0


if __name__ == "__main__":
    # --- small deterministic config -----------------------------------------
    B, S, D = 8, 16, 32
    num_users, num_items = 10, 50
    padding_idx = num_items  # nn.Embedding(num_items + 1, D, padding_idx=num_items)

    key = jax.random.PRNGKey(0)
    keys = jax.random.split(key, 16)

    item_table = jax.random.normal(keys[0], (num_items + 1, D), jnp.float32) * 0.1
    item_table = item_table.at[padding_idx].set(0.0)     # padding row is zeros
    user_table = jax.random.normal(keys[1], (num_users, D), jnp.float32) * 0.1

    # query_fc: Linear(2D -> D); stored as (in, out) for x @ W
    wq = jax.random.normal(keys[2], (2 * D, D), jnp.float32) * 0.1
    bq = jax.random.normal(keys[3], (1, D), jnp.float32) * 0.1
    bnq_g = 1.0 + 0.1 * jax.random.normal(keys[4], (1, D), jnp.float32)
    bnq_b = 0.1 * jax.random.normal(keys[5], (1, D), jnp.float32)
    bnq_m = 0.1 * jax.random.normal(keys[6], (1, D), jnp.float32)
    bnq_v = 1.0 + 0.1 * jax.random.uniform(keys[7], (1, D), jnp.float32)

    # candidate_fc: Linear(D -> D)
    wc = jax.random.normal(keys[8], (D, D), jnp.float32) * 0.1
    bc = jax.random.normal(keys[9], (1, D), jnp.float32) * 0.1
    bnc_g = 1.0 + 0.1 * jax.random.normal(keys[10], (1, D), jnp.float32)
    bnc_b = 0.1 * jax.random.normal(keys[11], (1, D), jnp.float32)
    bnc_m = 0.1 * jax.random.normal(keys[12], (1, D), jnp.float32)
    bnc_v = 1.0 + 0.1 * jax.random.uniform(keys[13], (1, D), jnp.float32)

    # inputs
    user_ids = jax.random.randint(keys[14], (B,), 0, num_users)
    item_seq = jax.random.randint(keys[15], (B, S), -1, num_items)  # includes -1 padding
    candidate_items = jax.random.randint(jax.random.fold_in(key, 99), (B,), 0, num_items)

    # --- glue: replace -1, gathers, count. The item table is stored in bf16,
    #     so the gather already yields the bf16 stream the kernel consumes
    #     (no extra cast/pad pass over HBM). Padding rows stay exactly zero.
    item_seq_p = jnp.where(item_seq == -1, padding_idx, item_seq)
    mask_f = (item_seq_p != padding_idx).astype(jnp.float32)[:, :, None]   # (B,S,1)
    count = jnp.maximum(jnp.sum(mask_f, axis=1), 1.0)                      # (B,1)
    seq_embeds_bf16 = item_table.astype(jnp.bfloat16)[item_seq_p]          # (B,S,D)
    user_embed = user_table[user_ids]                                      # (B,D)
    cand_embed = item_table[candidate_items]                               # (B,D)

    params = (wq, bq, bnq_g, bnq_b, bnq_m, bnq_v,
              wc, bc, bnc_g, bnc_b, bnc_m, bnc_v)

    out = jax.block_until_ready(
        two_tower_forward_pallas(seq_embeds_bf16, count, user_embed, cand_embed, *params))
    ref = jax.block_until_ready(
        two_tower_forward_ref(seq_embeds_bf16.astype(jnp.float32), mask_f,
                              user_embed, cand_embed, *params))

    assert out.shape == (B,)
    assert jnp.allclose(out, ref, rtol=1e-4, atol=1e-5), (out, ref)
    print("KERNEL_OK")
</pallas_src>

<mosaic_0001>
module attributes {stable_mosaic.version = 11 : i64} {
  func.func @_two_tower_kernel(%arg0: i32, %arg1: memref<8x512xbf16, #tpu.memory_space<vmem>>, %arg2: memref<8x128xf32, #tpu.memory_space<vmem>>, %arg3: memref<512x128xbf16, #tpu.memory_space<vmem>>, %arg4: memref<128x256xf32, #tpu.memory_space<vmem>>, %arg5: memref<128x128xf32, #tpu.memory_space<vmem>>, %arg6: memref<1x256xf32, #tpu.memory_space<vmem>>, %arg7: memref<8x1xf32, #tpu.memory_space<vmem>>) attributes {dimension_semantics = [#tpu.dimension_semantics<parallel>], iteration_bounds = array<i64: 1>, scalar_prefetch = 0 : i64, scratch_operands = 0 : i64, tpu.core_type = #tpu.core_type<tc>, window_params = [{transform_indices = @transform_0, window_bounds = array<i64: 8, 512>}, {transform_indices = @transform_1, window_bounds = array<i64: 8, 128>}, {pipeline_mode = #tpu.pipeline_mode<synchronous>, transform_indices = @transform_2, window_bounds = array<i64: 512, 128>}, {pipeline_mode = #tpu.pipeline_mode<synchronous>, transform_indices = @transform_3, window_bounds = array<i64: 128, 256>}, {pipeline_mode = #tpu.pipeline_mode<synchronous>, transform_indices = @transform_4, window_bounds = array<i64: 128, 128>}, {pipeline_mode = #tpu.pipeline_mode<synchronous>, transform_indices = @transform_5, window_bounds = array<i64: 1, 256>}, {transform_indices = @transform_6, window_bounds = array<i64: 8, 1>}]} {
    %c0 = arith.constant 0 : index
    %c0_0 = arith.constant 0 : index
    %0 = vector.load %arg1[%c0, %c0_0] : memref<8x512xbf16, #tpu.memory_space<vmem>>, vector<8x512xbf16>
    %c0_1 = arith.constant 0 : index
    %c0_2 = arith.constant 0 : index
    %1 = vector.load %arg3[%c0_1, %c0_2] : memref<512x128xbf16, #tpu.memory_space<vmem>>, vector<512x128xbf16>
    %cst = arith.constant dense<0.000000e+00> : vector<8x128xf32>
    %2 = tpu.matmul %0, %1, %cst {dimension_numbers = #tpu.dot_dimension_numbers<[1], [0], [0], [1], [0, 0, 1, 1], [], []>} : vector<8x512xbf16>, vector<512x128xbf16>, vector<8x128xf32> -> vector<8x128xf32>
    %c0_3 = arith.constant 0 : index
    %c0_4 = arith.constant 0 : index
    %3 = vector.load %arg2[%c0_3, %c0_4] : memref<8x128xf32, #tpu.memory_space<vmem>>, vector<8x128xf32>
    %4 = vector.extract_strided_slice %3 {offsets = [0, 127], sizes = [8, 1], strides = [1, 1]} : vector<8x128xf32> to vector<8x1xf32>
    %5 = vector.broadcast %4 : vector<8x1xf32> to vector<8x128xf32>
    %6 = arith.mulf %2, %5 : vector<8x128xf32>
    %c0_5 = arith.constant 0 : index
    %c0_6 = arith.constant 0 : index
    %7 = vector.load %arg4[%c0_5, %c0_6] : memref<128x256xf32, #tpu.memory_space<vmem>>, vector<128x256xf32>
    %cst_7 = arith.constant dense<0.000000e+00> : vector<8x256xf32>
    %8 = tpu.matmul %3, %7, %cst_7 {dimension_numbers = #tpu.dot_dimension_numbers<[1], [0], [0], [1], [0, 0, 1, 1], [], []>} : vector<8x128xf32>, vector<128x256xf32>, vector<8x256xf32> -> vector<8x256xf32>
    %c0_8 = arith.constant 0 : index
    %c0_9 = arith.constant 0 : index
    %9 = vector.load %arg6[%c0_8, %c0_9] : memref<1x256xf32, #tpu.memory_space<vmem>>, vector<1x256xf32>
    %10 = vector.broadcast %9 : vector<1x256xf32> to vector<8x256xf32>
    %11 = arith.addf %8, %10 : vector<8x256xf32>
    %12 = vector.extract_strided_slice %11 {offsets = [0, 0], sizes = [8, 128], strides = [1, 1]} : vector<8x256xf32> to vector<8x128xf32>
    %c0_10 = arith.constant 0 : index
    %c0_11 = arith.constant 0 : index
    %13 = vector.load %arg5[%c0_10, %c0_11] : memref<128x128xf32, #tpu.memory_space<vmem>>, vector<128x128xf32>
    %cst_12 = arith.constant dense<0.000000e+00> : vector<8x128xf32>
    %14 = tpu.matmul %6, %13, %cst_12 {dimension_numbers = #tpu.dot_dimension_numbers<[1], [0], [0], [1], [0, 0, 1, 1], [], []>} : vector<8x128xf32>, vector<128x128xf32>, vector<8x128xf32> -> vector<8x128xf32>
    %15 = arith.addf %12, %14 : vector<8x128xf32>
    %16 = vector.extract_strided_slice %11 {offsets = [0, 128], sizes = [8, 128], strides = [1, 1]} : vector<8x256xf32> to vector<8x128xf32>
    %17 = arith.mulf %15, %15 : vector<8x128xf32>
    %cst_13 = arith.constant dense<0.000000e+00> : vector<8xf32>
    %18 = vector.multi_reduction <add>, %17, %cst_13 [1] : vector<8x128xf32> to vector<8xf32>
    %19 = vector.shape_cast %18 : vector<8xf32> to vector<8x1xf32>
    %20 = math.rsqrt %19 : vector<8x1xf32>
    %cst_14 = arith.constant 9.99999995E+11 : f32
    %21 = vector.broadcast %cst_14 : f32 to vector<8x1xf32>
    %22 = arith.minimumf %20, %21 : vector<8x1xf32>
    %23 = arith.mulf %16, %16 : vector<8x128xf32>
    %cst_15 = arith.constant dense<0.000000e+00> : vector<8xf32>
    %24 = vector.multi_reduction <add>, %23, %cst_15 [1] : vector<8x128xf32> to vector<8xf32>
    %25 = vector.shape_cast %24 : vector<8xf32> to vector<8x1xf32>
    %26 = math.rsqrt %25 : vector<8x1xf32>
    %cst_16 = arith.constant 9.99999995E+11 : f32
    %27 = vector.broadcast %cst_16 : f32 to vector<8x1xf32>
    %28 = arith.minimumf %26, %27 : vector<8x1xf32>
    %29 = arith.mulf %15, %16 : vector<8x128xf32>
    %cst_17 = arith.constant dense<0.000000e+00> : vector<8xf32>
    %30 = vector.multi_reduction <add>, %29, %cst_17 [1] : vector<8x128xf32> to vector<8xf32>
    %31 = vector.shape_cast %30 : vector<8xf32> to vector<8x1xf32>
    %32 = arith.mulf %31, %22 : vector<8x1xf32>
    %33 = arith.mulf %32, %28 : vector<8x1xf32>
    %cst_18 = arith.constant 1.000000e+00 : f32
    %34 = vector.broadcast %cst_18 : f32 to vector<8x1xf32>
    %35 = arith.addf %33, %34 : vector<8x1xf32>
    %cst_19 = arith.constant 5.000000e-01 : f32
    %36 = vector.broadcast %cst_19 : f32 to vector<8x1xf32>
    %37 = arith.mulf %35, %36 : vector<8x1xf32>
    %c0_20 = arith.constant 0 : index
    %c0_21 = arith.constant 0 : index
    %38 = vector.load %arg7[%c0_20, %c0_21] : memref<8x1xf32, #tpu.memory_space<vmem>>, vector<8x1xf32>
    tpu.vector_store %arg7[%c0_20, %c0_21], %37 {strides = array<i32>} : memref<8x1xf32, #tpu.memory_space<vmem>>, vector<8x1xf32>,
    return
  }
  func.func @transform_0(%arg0: i32) -> (i32, i32) {
    %c0_i32 = arith.constant 0 : i32
    %c0_i32_0 = arith.constant 0 : i32
    return %arg0, %c0_i32 : i32, i32
  }
  func.func @transform_1(%arg0: i32) -> (i32, i32) {
    %c0_i32 = arith.constant 0 : i32
    %c0_i32_0 = arith.constant 0 : i32
    return %arg0, %c0_i32 : i32, i32
  }
  func.func @transform_2(%arg0: i32) -> (i32, i32) {
    %c0_i32 = arith.constant 0 : i32
    %c0_i32_0 = arith.constant 0 : i32
    %c0_i32_1 = arith.constant 0 : i32
    return %c0_i32, %c0_i32_0 : i32, i32
  }
  func.func @transform_3(%arg0: i32) -> (i32, i32) {
    %c0_i32 = arith.constant 0 : i32
    %c0_i32_0 = arith.constant 0 : i32
    %c0_i32_1 = arith.constant 0 : i32
    return %c0_i32, %c0_i32_0 : i32, i32
  }
  func.func @transform_4(%arg0: i32) -> (i32, i32) {
    %c0_i32 = arith.constant 0 : i32
    %c0_i32_0 = arith.constant 0 : i32
    %c0_i32_1 = arith.constant 0 : i32
    return %c0_i32, %c0_i32_0 : i32, i32
  }
  func.func @transform_5(%arg0: i32) -> (i32, i32) {
    %c0_i32 = arith.constant 0 : i32
    %c0_i32_0 = arith.constant 0 : i32
    %c0_i32_1 = arith.constant 0 : i32
    return %c0_i32, %c0_i32_0 : i32, i32
  }
  func.func @transform_6(%arg0: i32) -> (i32, i32) {
    %c0_i32 = arith.constant 0 : i32
    %c0_i32_0 = arith.constant 0 : i32
    return %arg0, %c0_i32 : i32, i32
  }
}

</mosaic_0001>

<bundles_post_ra>
// kernel: two_tower_forward_pallas.1
= control target key start
LH: loop header
LB: loop body
LE: loop exit
PB: predicated region body
PF: predicated region fallthrough
CT: control target
= control target key end

     0   :  { %v841_v1 = vmov 127   ;;  %v842_v47 = vmov 0.0|0.0   ;;  %vm844_vm0 = vmmov 0   ;;  %vm602_vm1 = vcmask 7168   ;;  %s1147_s2 = inlined_call_operand.vmem [shape: bf16[512,128], index: 2, kind: input, shape index: {}]   ;;  %s1148_s0 = inlined_call_operand.vmem [shape: bf16[8,512], index: 0, kind: input, shape index: {}]   ;;  %s1149_s1 = inlined_call_operand.vmem [shape: f32[8,128], index: 1, kind: input, shape index: {}]   ;;  %s1150_s3 = inlined_call_operand.vmem [shape: f32[128,256], index: 3, kind: input, shape index: {}]   ;;  %s1151_s4 = inlined_call_operand.vmem [shape: f32[128,128], index: 4, kind: input, shape index: {}]   ;;  %s1152_s5 = inlined_call_operand.vmem [shape: f32[1,256], index: 5, kind: input, shape index: {}]   ;;  %s1153_s6 = inlined_call_operand.vmem [shape: f32[8,1], index: 6, kind: output, shape index: {}]  }
   0x1   :  { %v801_v0 = vld [vmem:[%s1147_s2 + $0x40] sm:$0xff]   ;;  %800 = vset.pattern.permute.xlu0 %v841_v1  ;;  %v805_v5 = vld [vmem:[%s1147_s2 + $0x48] sm:$0xff]   ;;  %v809_v9 = vld [vmem:[%s1147_s2 + $0x50] sm:$0xff]  }
   0x2   :  { %v802_v2 = vld [vmem:[%s1147_s2 + $0xc0] sm:$0xff]   ;;  %644 = vmatprep.subr.bf16.mxu0 %v801_v0  ;;  %v806_v6 = vld [vmem:[%s1147_s2 + $0xc8] sm:$0xff]   ;;  %v810_v10 = vld [vmem:[%s1147_s2 + $0xd0] sm:$0xff]  }
   0x3   :  { %v803_v3 = vld [vmem:[%s1147_s2] sm:$0xff]   ;;  %666 = vmatprep.subr.bf16.mxu1 %v802_v2  ;;  %v807_v7 = vld [vmem:[%s1147_s2 + $0x8] sm:$0xff]   ;;  %v811_v11 = vld [vmem:[%s1147_s2 + $0x10] sm:$0xff]  }
   0x4   :  { %v804_v4 = vld [vmem:[%s1147_s2 + $0x80] sm:$0xff]   ;;  %645 = vmatpush3.bf16.msra.mxu0 %v803_v3  ;;  %v808_v8 = vld [vmem:[%s1147_s2 + $0x88] sm:$0xff]   ;;  %v812_v12 = vld [vmem:[%s1147_s2 + $0x90] sm:$0xff]  }
   0x5   :  { %667 = vmatpush3.bf16.msra.mxu1 %v804_v4  ;;  %646 = vmatprep.subr.bf16.mxu0 %v805_v5  ;;  %v813_v13 = vld [vmem:[%s1147_s2 + $0x58] sm:$0xff]   ;;  %v817_v17 = vld [vmem:[%s1147_s2 + $0x60] sm:$0xff]   ;;  %v821_v21 = vld [vmem:[%s1147_s2 + $0x68] sm:$0xff]  }
   0x6   :  { %668 = vmatprep.subr.bf16.mxu1 %v806_v6  ;;  %v814_v14 = vld [vmem:[%s1147_s2 + $0xd8] sm:$0xff]   ;;  %v818_v18 = vld [vmem:[%s1147_s2 + $0xe0] sm:$0xff]   ;;  %v822_v22 = vld [vmem:[%s1147_s2 + $0xe8] sm:$0xff]  }
   0x7   :  { %v815_v15 = vld [vmem:[%s1147_s2 + $0x18] sm:$0xff]   ;;  %v819_v19 = vld [vmem:[%s1147_s2 + $0x20] sm:$0xff]   ;;  %v823_v23 = vld [vmem:[%s1147_s2 + $0x28] sm:$0xff]  }
   0x8   :  { %647 = vmatpush3.bf16.msra.mxu0 %v807_v7  ;;  %v816_v16 = vld [vmem:[%s1147_s2 + $0x98] sm:$0xff]   ;;  %v820_v20 = vld [vmem:[%s1147_s2 + $0xa0] sm:$0xff]   ;;  %v824_v24 = vld [vmem:[%s1147_s2 + $0xa8] sm:$0xff]  }
   0x9   :  { %669 = vmatpush3.bf16.msra.mxu1 %v808_v8  ;;  %648 = vmatprep.subr.bf16.mxu0 %v809_v9  ;;  %v825_v25 = vld [vmem:[%s1147_s2 + $0x70] sm:$0xff]   ;;  %v829_v29 = vld [vmem:[%s1147_s2 + $0x78] sm:$0xff]   ;;  %v24_v33 = vld [vmem:[%s1148_s0] sm:$0xff] }
   0xa   :  { %670 = vmatprep.subr.bf16.mxu1 %v810_v10  ;;  %v826_v26 = vld [vmem:[%s1147_s2 + $0xf0] sm:$0xff]   ;;  %v830_v30 = vld [vmem:[%s1147_s2 + $0xf8] sm:$0xff]   ;;  %v25_v34 = vld [vmem:[%s1148_s0 + $0x8] sm:$0xff]  ;;  %v608_v36 = vcombine.low %v24_v33, %v24_v33  ;;  %v609_v37 = vcombine.high %v24_v33, %v24_v33 }
   0xb   :  { %v827_v27 = vld [vmem:[%s1147_s2 + $0x30] sm:$0xff]   ;;  %v831_v31 = vld [vmem:[%s1147_s2 + $0x38] sm:$0xff]   ;;  %v985_v35 = vld [vmem:[%s1149_s1] sm:$0xff]  ;;  %v610_v38 = vcombine.low %v25_v34, %v25_v34  ;;  %v611_v39 = vcombine.high %v25_v34, %v25_v34 }
   0xc   :  { %649 = vmatpush3.bf16.msra.mxu0 %v811_v11  ;;  %v828_v28 = vld [vmem:[%s1147_s2 + $0xb0] sm:$0xff]   ;;  %v832_v32 = vld [vmem:[%s1147_s2 + $0xb8] sm:$0xff]   ;;  %v384_v40 = vld [vmem:[%s1150_s3 + $0x8] sm:$0xff]  ;;  %379 = vperm.xlu0 %800, %v985_v35  }
   0xd   :  { %671 = vmatpush3.bf16.msra.mxu1 %v812_v12  ;;  %650 = vmatprep.subr.bf16.mxu0 %v813_v13  ;;  %v386_v41 = vld [vmem:[%s1150_s3 + $0x18] sm:$0xff]  ;;  %v383_v42 = vld [vmem:[%s1150_s3] sm:$0xff]  ;;  %v385_v44 = vld [vmem:[%s1150_s3 + $0x10] sm:$0xff] }
   0xe   :  { %672 = vmatprep.subr.bf16.mxu1 %v814_v14  ;;  %v740_v43 = vpack.c.bf16 %v386_v41, %v384_v40  ;;  %v388_v45 = vld [vmem:[%s1150_s3 + $0x28] sm:$0xff]  ;;  %v390_v46 = vld [vmem:[%s1150_s3 + $0x38] sm:$0xff]  ;;  %328 = vmatprep.mubr.bf16.mxu0 %v609_v37  ;;  %v742_v48 = vpack.c.bf16 %v385_v44, %v383_v42  ;;  %v387_v50 = vld [vmem:[%s1150_s3 + $0x20] sm:$0xff] }
   0xf   :  { %368 = vmatprep.mubr.bf16.mxu1 %v611_v39  ;;  %v744_v49 = vpack.c.bf16 %v390_v46, %v388_v45  ;;  %v389_v51 = vld [vmem:[%s1150_s3 + $0x30] sm:$0xff]  ;;  %v498_v52 = vld [vmem:[%s1151_s4] sm:$0xff]  ;;  %v499_v53 = vld [vmem:[%s1151_s4 + $0x8] sm:$0xff] }
  0x10   :  { %651 = vmatpush3.bf16.msra.mxu0 %v815_v15  ;;  %v392_v54 = vld [vmem:[%s1150_s3 + $0x48] sm:$0xff]  ;;  %v394_v55 = vld [vmem:[%s1150_s3 + $0x58] sm:$0xff]  ;;  %v773_v56 = vpack.c.bf16 %v499_v53, %v498_v52  ;;  %v500_v57 = vld [vmem:[%s1151_s4 + $0x10] sm:$0xff]  ;;  %v746_v58 = vpack.c.bf16 %v389_v51, %v387_v50 }
  0x11   :  { %673 = vmatpush3.bf16.msra.mxu1 %v816_v16  ;;  %652 = vmatprep.subr.bf16.mxu0 %v817_v17  ;;  %v501_v59 = vld [vmem:[%s1151_s4 + $0x18] sm:$0xff]  ;;  %v748_v60 = vpack.c.bf16 %v394_v55, %v392_v54  ;;  %v391_v61 = vld [vmem:[%s1150_s3 + $0x40] sm:$0xff]  ;;  %v393_v62 = vld [vmem:[%s1150_s3 + $0x50] sm:$0xff] }
  0x12   :  { %674 = vmatprep.subr.bf16.mxu1 %v818_v18  ;;  %v776_v63 = vpack.c.bf16 %v501_v59, %v500_v57  ;;  %v396_v0 = vld [vmem:[%s1150_s3 + $0x68] sm:$0xff]  ;;  %v398_v1 = vld [vmem:[%s1150_s3 + $0x78] sm:$0xff]  ;;  %v502_v2 = vld [vmem:[%s1151_s4 + $0x20] sm:$0xff]  ;;  %v750_v4 = vpack.c.bf16 %v393_v62, %v391_v61 }
  0x13   :  { %v503_v3 = vld [vmem:[%s1151_s4 + $0x28] sm:$0xff]  ;;  %v752_v5 = vpack.c.bf16 %v398_v1, %v396_v0  ;;  %v395_v6 = vld [vmem:[%s1150_s3 + $0x60] sm:$0xff]  ;;  %v397_v7 = vld [vmem:[%s1150_s3 + $0x70] sm:$0xff]  ;;  %v417_v0 = vlaneseq }
  0x14   :  { %653 = vmatpush3.bf16.msra.mxu0 %v819_v19  ;;  %v779_v8 = vpack.c.bf16 %v503_v3, %v502_v2  ;;  %v400_v9 = vld [vmem:[%s1150_s3 + $0x88] sm:$0xff]  ;;  %v402_v10 = vld [vmem:[%s1150_s3 + $0x98] sm:$0xff]  ;;  %v504_v11 = vld [vmem:[%s1151_s4 + $0x30] sm:$0xff]  ;;  %v754_v13 = vpack.c.bf16 %v397_v7, %v395_v6 }
  0x15   :  { %675 = vmatpush3.bf16.msra.mxu1 %v820_v20  ;;  %654 = vmatprep.subr.bf16.mxu0 %v821_v21  ;;  %v505_v12 = vld [vmem:[%s1151_s4 + $0x38] sm:$0xff]  ;;  %v756_v14 = vpack.c.bf16 %v402_v10, %v400_v9  ;;  %v399_v15 = vld [vmem:[%s1150_s3 + $0x80] sm:$0xff]  ;;  %v401_v16 = vld [vmem:[%s1150_s3 + $0x90] sm:$0xff] }
  0x16   :  { %676 = vmatprep.subr.bf16.mxu1 %v822_v22  ;;  %v782_v17 = vpack.c.bf16 %v505_v12, %v504_v11  ;;  %v404_v18 = vld [vmem:[%s1150_s3 + $0xa8] sm:$0xff]  ;;  %v406_v19 = vld [vmem:[%s1150_s3 + $0xb8] sm:$0xff]  ;;  %v506_v20 = vld [vmem:[%s1151_s4 + $0x40] sm:$0xff]  ;;  %v758_v22 = vpack.c.bf16 %v401_v16, %v399_v15 }
  0x17   :  { %v507_v21 = vld [vmem:[%s1151_s4 + $0x48] sm:$0xff]  ;;  %v407_v33 = vld [vmem:[%s1150_s3 + $0xc0] sm:$0xff]  ;;  %v409_v34 = vld [vmem:[%s1150_s3 + $0xd0] sm:$0xff] }
  0x18   :  { %655 = vmatpush3.bf16.msra.mxu0 %v823_v23  ;;  %v760_v23 = vpack.c.bf16 %v406_v19, %v404_v18  ;;  %v412_v37 = vld [vmem:[%s1150_s3 + $0xe8] sm:$0xff]  ;;  %v766_v39 = vpack.c.bf16 %v409_v34, %v407_v33  ;;  %v411_v41 = vld [vmem:[%s1150_s3 + $0xe0] sm:$0xff]  ;;  %v413_v42 = vld [vmem:[%s1150_s3 + $0xf0] sm:$0xff] }
  0x19   :  { %677 = vmatpush3.bf16.msra.mxu1 %v824_v24  ;;  %656 = vmatprep.subr.bf16.mxu0 %v825_v25  ;;  %v403_v24 = vld [vmem:[%s1150_s3 + $0xa0] sm:$0xff]  ;;  %v405_v25 = vld [vmem:[%s1150_s3 + $0xb0] sm:$0xff]  ;;  %v511_v45 = vld [vmem:[%s1151_s4 + $0x68] sm:$0xff] }
  0x1a   :  { %678 = vmatprep.subr.bf16.mxu1 %v826_v26  ;;  %v785_v26 = vpack.c.bf16 %v507_v21, %v506_v20  ;;  %v510_v44 = vld [vmem:[%s1151_s4 + $0x60] sm:$0xff]  ;;  %v513_v50 = vld [vmem:[%s1151_s4 + $0x78] sm:$0xff] }
  0x1b   :  { %v791_v46 = vpack.c.bf16 %v511_v45, %v510_v44  ;;  %v415_v2 = vld [vmem:[%s1152_s5] sm:$0x3] }
  0x1c   :  { %657 = vmatpush3.bf16.msra.mxu0 %v827_v27  ;;  %v408_v27 = vld [vmem:[%s1150_s3 + $0xc8] sm:$0xff] }
  0x1d   :  { %679 = vmatpush3.bf16.msra.mxu1 %v828_v28  ;;  %658 = vmatprep.subr.bf16.mxu0 %v829_v29  ;;  %v410_v28 = vld [vmem:[%s1150_s3 + $0xd8] sm:$0xff]  ;;  %v508_v29 = vld [vmem:[%s1151_s4 + $0x50] sm:$0xff] }
  0x1e   :  { %680 = vmatprep.subr.bf16.mxu1 %v830_v30  ;;  %v509_v30 = vld [vmem:[%s1151_s4 + $0x58] sm:$0xff] }
  0x20   :  { %659 = vmatpush3.bf16.msra.mxu0 %v831_v31  ;;  %v762_v31 = vpack.c.bf16 %v405_v25, %v403_v24 }
  0x21   :  { %681 = vmatpush3.bf16.msra.mxu1 %v832_v32  ;;  %741 = vmatprep.subr.bf16.mxu0 %v740_v43  ;;  %v764_v32 = vpack.c.bf16 %v410_v28, %v408_v27  ;;  %v770_v43 = vpack.c.bf16 %v413_v42, %v411_v41 }
  0x22   :  { %772 = vmatprep.subr.bf16.mxu1 %v842_v47 }
  0x23   :  { %329 = vmatmul.mubr.bf16.vlgmr.msra.gmra.mrb[0].mxu0 %v608_v36  ;;  %v788_v36 = vpack.c.bf16 %v509_v30, %v508_v29 }
  0x24   :  { %369 = vmatmul.mubr.bf16.vlgmr.msra.gmra.mrb[0].mxu1 %v610_v38  ;;  %743 = vmatpush1.bf16.msra.mxu0 %v742_v48  ;;  %v414_v38 = vld [vmem:[%s1150_s3 + $0xf8] sm:$0xff]  ;;  %v843_v48 = vmov 0.0  }
  0x25   :  { %745 = vmatprep.subr.bf16.mxu0 %v744_v49  ;;  %774 = vmatpush3.bf16.msra.mxu1 %v773_v56  ;;  %v768_v40 = vpack.c.bf16 %v414_v38, %v412_v37  ;;  %v512_v49 = vld [vmem:[%s1151_s4 + $0x70] sm:$0xff] }
  0x26   :  { %775 = vmatprep.subr.bf16.mxu1 %v842_v47  ;;  %491 = vmatprep.mubr.f32.mxu0 %v843_v48  ;;  %v794_v51 = vpack.c.bf16 %v513_v50, %v512_v49 }
  0x27   :  { %737 = vmatprep.mubr.msk.f32.mxu1 %vm844_vm0, %v843_v48 }
  0x28   :  { %747 = vmatpush1.bf16.msra.mxu0 %v746_v58 }
  0x29   :  { %749 = vmatprep.subr.bf16.mxu0 %v748_v60  ;;  %777 = vmatpush3.bf16.msra.mxu1 %v776_v63 }
  0x2a   :  { %778 = vmatprep.subr.bf16.mxu1 %v842_v47 }
  0x2c   :  { %751 = vmatpush1.bf16.msra.mxu0 %v750_v4 }
  0x2d   :  { %753 = vmatprep.subr.bf16.mxu0 %v752_v5  ;;  %780 = vmatpush3.bf16.msra.mxu1 %v779_v8 }
  0x2e   :  { %781 = vmatprep.subr.bf16.mxu1 %v842_v47 }
  0x30   :  { %755 = vmatpush1.bf16.msra.mxu0 %v754_v13 }
  0x31   :  { %757 = vmatprep.subr.bf16.mxu0 %v756_v14  ;;  %783 = vmatpush3.bf16.msra.mxu1 %v782_v17 }
  0x32   :  { %784 = vmatprep.subr.bf16.mxu1 %v842_v47 }
  0x34   :  { %759 = vmatpush1.bf16.msra.mxu0 %v758_v22 }
  0x35   :  { %761 = vmatprep.subr.bf16.mxu0 %v760_v23  ;;  %786 = vmatpush3.bf16.msra.mxu1 %v785_v26 }
  0x36   :  { %787 = vmatprep.subr.bf16.mxu1 %v842_v47 }
  0x38   :  { %763 = vmatpush1.bf16.msra.mxu0 %v762_v31 }
  0x39   :  { %765 = vmatprep.subr.bf16.mxu0 %v764_v32  ;;  %789 = vmatpush3.bf16.msra.mxu1 %v788_v36 }
  0x3a   :  { %790 = vmatprep.subr.bf16.mxu1 %v842_v47 }
  0x3c   :  { %767 = vmatpush1.bf16.msra.mxu0 %v766_v39 }
  0x3d   :  { %769 = vmatprep.subr.bf16.mxu0 %v768_v40  ;;  %792 = vmatpush3.bf16.msra.mxu1 %v791_v46 }
  0x3e   :  { %793 = vmatprep.subr.bf16.mxu1 %v842_v47 }
  0x40   :  { %771 = vmatpush1.bf16.msra.mxu0 %v770_v43 }
  0x41   :  { %795 = vmatpush3.bf16.msra.mxu1 %v794_v51 }
  0x43   :  { %492 = vmatmul.mubr.f32.vlgmr.msra.gmra.mrb[4].mxu0 %v985_v35  ;;  %v418_v35 = vshrl.u32 %v417_v0, 7 }
  0x45   :  { %v423_v1 = vsub.s32 1, %v418_v35  ;;  %v419_v8 = vsub.s32 0, %v418_v35 }
  0x47   :  { %v424_v3 = vrot.slane %v415_v2, %v423_v1  ;;  %v420_v9 = vrot.slane %v415_v2, %v419_v8 }
  0x8b   :  { %v380_v52 = vpop.permute.xlu0 %379 }
  0xf6   :  { %v660_v53 = vpop.f32.mrb[0].mxu0 }
  0xf7   :  { %v682_v54 = vpop.f32.mrb[0].mxu1  ;;  %v661_v55 = vpop.f32.mrb[1].mxu0 }
  0xf8   :  { %v683_v56 = vpop.f32.mrb[1].mxu1  ;;  %v662_v47 = vadd.f32 %v661_v55, %v660_v53  ;;  %v663_v58 = vpop.f32.mrb[2].mxu0 }
  0xf9   :  { %v684_v57 = vadd.f32 %v683_v56, %v682_v54  ;;  %v685_v59 = vpop.f32.mrb[2].mxu1  ;;  %v664_v60 = vpop.f32.mrb[3].mxu0 }
  0xfa   :  { %v686_v61 = vpop.f32.mrb[3].mxu1 }
  0xfb   :  { %v371_v62 = vadd.f32 %v684_v57, %v662_v47 }
  0xfd   :  { %v382_v63 = vmul.f32 %v380_v52, %v371_v62 }
  0xff   :  { %738 = vmatmul.mubr.f32.vlgmr.msra.gmra.mrb[4].mxu1 %v382_v63 }
 0x116   :  { %v493_v4 = vpop.f32.mrb[4].mxu0 }
 0x117   :  { %v495_v5 = vpop.f32.mrb[5].mxu0  ;;  %v494_v10 = vadd.f32 %v493_v4, %v420_v9 }
 0x118   :  { %v496_v6 = vadd.f32 %v495_v5, %v424_v3 }
 0x11a   :  { %v590_v7 = vmul.f32 %v496_v6, %v496_v6 }
 0x11c   :  { %591 = vadd.xlane.f32.xlu1 %v590_v7 }
 0x1a9   :  { %v592_v16 = vpop.xlane.xlu1 %591 }
 0x1aa   :  { %837 = vrsqrt.f32 %v592_v16 }
 0x1b4   :  { %v838_v18 = vpop.eup %837 }
 0x1b5   :  { %v594_v22 = vmin.f32 %v838_v18, 1e+12 }
 0x1d2   :  { %v580_v11 = vpop.f32.mrb[4].mxu1 }
 0x1d3   :  { %v584_v12 = vadd.f32 %v580_v11, %v494_v10  ;;  %v739_v13 = vpop.f32.mrb[5].mxu1 }
 0x1d5   :  { %v595_v14 = vmul.f32 %v584_v12, %v496_v6  ;;  %v585_v15 = vmul.f32 %v584_v12, %v584_v12 }
 0x1d7   :  { %596 = vadd.xlane.f32.xlu1 %v595_v14  ;;  %586 = vadd.xlane.f32.xlu0 %v585_v15 }
 0x264   :  { %v587_v17 = vpop.xlane.xlu0 %586  ;;  %v597_v21 = vpop.xlane.xlu1 %596 }
 0x265   :  { %839 = vrsqrt.f32 %v587_v17 }
 0x26f   :  { %v840_v19 = vpop.eup %839 }
 0x270   :  { %v589_v20 = vmin.f32 %v840_v19, 1e+12 }
 0x272   :  { %v598_v23 = vmul.f32 %v597_v21, %v589_v20 }
 0x274   :  { %v599_v24 = vmul.f32 %v598_v23, %v594_v22 }
 0x276   :  { %v600_v25 = vadd.f32 1.0, %v599_v24 }
 0x278   :  { %v601_v26 = vmul.f32 0.5, %v600_v25 }
 0x27a   :  { %603 = vst.msk [vmem:[%s1153_s6] sm:$0xff] %vm602_vm1, %v601_v26 }

</bundles_post_ra>
